<compile_context>
chip_gen: v7x
topology: tpu7x:2x2x1
jax: 0.10.0
libtpu: 0.0.40
codegen_flags: <defaults>
</compile_context>

<pallas_src>
import functools

import jax
import jax.numpy as jnp
from jax.experimental import pallas as pl
from jax.experimental.pallas import tpu as pltpu

# ---- problem sizes (small, consistent with the module: tokens of a tiny transformer) ----
B = 2                      # batch
N = 8                      # tokens per sample
IN_F = 32                  # in_features
HID = int(IN_F * 4.0)      # hidden_features = 128 (mlp_ratio = 4.0) — lane-dense
OUT_F = IN_F               # out_features (defaults to in_features)

MAX_BLOCK_ROWS = 256       # row-tile ceiling for large inputs (keeps VMEM small)


def _gelu_tanh(x):
    # tanh-form GELU (lowers to the EUP tanh slot); |err| vs exact erf GELU < 1e-3.
    c = 0.7978845608028654  # sqrt(2 / pi)
    return 0.5 * x * (1.0 + jnp.tanh(c * (x + 0.044715 * x * x * x)))


def mlp_kernel(x_ref, w1_ref, b1_ref, w2_ref, b2_ref, o_ref):
    x = x_ref[...]                                                     # (bm, IN_F) f32

    # fc1: bf16 operands on the MXU, f32 accumulation; bias add in f32.
    h = jnp.dot(x.astype(jnp.bfloat16), w1_ref[...],
                preferred_element_type=jnp.float32) + b1_ref[...]      # (bm, HID)

    # GELU (dropout with p=0.0 / eval mode is identity).
    h = _gelu_tanh(h)

    # fc2: bf16 operands, f32 accumulation.
    y = jnp.dot(h.astype(jnp.bfloat16), w2_ref[...],
                preferred_element_type=jnp.float32) + b2_ref[...]      # (bm, OUT_F)

    o_ref[...] = y.astype(o_ref.dtype)


def mlp_forward(x, params):
    """x: (..., IN_F) -> (..., OUT_F); mirrors Mlp.forward in eval mode."""
    lead_shape = x.shape[:-1]
    rows = 1
    for d in lead_shape:
        rows *= d
    x_rows = x.reshape(rows, IN_F)

    # Row tile: whole slab if it fits, otherwise MAX_BLOCK_ROWS-row tiles.
    bm = rows if rows <= MAX_BLOCK_ROWS else MAX_BLOCK_ROWS
    grid = (pl.cdiv(rows, bm),)

    # Pre-cast MXU weights to bf16 (halves weight DMA); biases stay f32, 2-D for broadcast.
    w1 = params["fc1_w"].astype(jnp.bfloat16)                          # (IN_F, HID)
    b1 = params["fc1_b"].reshape(1, HID)
    w2 = params["fc2_w"].astype(jnp.bfloat16)                          # (HID, OUT_F)
    b2 = params["fc2_b"].reshape(1, OUT_F)

    in_specs = [
        pl.BlockSpec((bm, IN_F), lambda i: (i, 0)),                    # row tile
        pl.BlockSpec((IN_F, HID), lambda i: (0, 0)),                   # weights resident
        pl.BlockSpec((1, HID), lambda i: (0, 0)),
        pl.BlockSpec((HID, OUT_F), lambda i: (0, 0)),
        pl.BlockSpec((1, OUT_F), lambda i: (0, 0)),
    ]
    out_specs = pl.BlockSpec((bm, OUT_F), lambda i: (i, 0))

    y_rows = pl.pallas_call(
        mlp_kernel,
        grid_spec=pltpu.PrefetchScalarGridSpec(
            num_scalar_prefetch=0,
            grid=grid,
            in_specs=in_specs,
            out_specs=out_specs,
        ),
        out_shape=jax.ShapeDtypeStruct((rows, OUT_F), x.dtype),
        compiler_params=pltpu.CompilerParams(
            dimension_semantics=("parallel",)),
    )(x_rows, w1, b1, w2, b2)

    return y_rows.reshape(lead_shape + (OUT_F,))


def ref_mlp(x, params):
    """Pure-JAX reference mirroring the PyTorch Mlp forward (eval mode, f32, exact GELU)."""
    h = x @ params["fc1_w"] + params["fc1_b"]
    h = jax.nn.gelu(h, approximate=False)
    y = h @ params["fc2_w"] + params["fc2_b"]
    return y


def init_params(key):
    ks = jax.random.split(key, 4)
    return {
        # Linear weights pre-transposed to (in, out); small scale keeps magnitudes sane.
        "fc1_w": 0.02 * jax.random.normal(ks[0], (IN_F, HID), jnp.float32),
        "fc1_b": 0.02 * jax.random.normal(ks[1], (HID,), jnp.float32),
        "fc2_w": 0.02 * jax.random.normal(ks[2], (HID, OUT_F), jnp.float32),
        "fc2_b": 0.02 * jax.random.normal(ks[3], (OUT_F,), jnp.float32),
    }


if __name__ == "__main__":
    key = jax.random.PRNGKey(0)
    kx, kp = jax.random.split(key)
    x = jax.random.normal(kx, (B, N, IN_F), jnp.float32)
    params = init_params(kp)

    # TODO(synk): training-mode dropout (random Bernoulli mask) is not implemented; the
    # module default drop=0.0 (and eval mode) makes it an identity, which is what we fuse.
    y = mlp_forward(x, params)
    y = jax.block_until_ready(y)

    y_ref = ref_mlp(x, params)
    assert y.shape == (B, N, OUT_F)
    assert jnp.allclose(y, y_ref, atol=2e-3, rtol=2e-3), "Mlp output mismatch"

    print("KERNEL_OK")
</pallas_src>

<mosaic_0001>
module attributes {stable_mosaic.version = 11 : i64} {
  func.func @mlp_kernel(%arg0: i32, %arg1: memref<16x32xf32, #tpu.memory_space<vmem>>, %arg2: memref<32x128xbf16, #tpu.memory_space<vmem>>, %arg3: memref<1x128xf32, #tpu.memory_space<vmem>>, %arg4: memref<128x32xbf16, #tpu.memory_space<vmem>>, %arg5: memref<1x32xf32, #tpu.memory_space<vmem>>, %arg6: memref<16x32xf32, #tpu.memory_space<vmem>>) attributes {dimension_semantics = [#tpu.dimension_semantics<parallel>], iteration_bounds = array<i64: 1>, scalar_prefetch = 0 : i64, scratch_operands = 0 : i64, tpu.core_type = #tpu.core_type<tc>, window_params = [{transform_indices = @transform_0, window_bounds = array<i64: 16, 32>}, {pipeline_mode = #tpu.pipeline_mode<synchronous>, transform_indices = @transform_1, window_bounds = array<i64: 32, 128>}, {pipeline_mode = #tpu.pipeline_mode<synchronous>, transform_indices = @transform_2, window_bounds = array<i64: 1, 128>}, {pipeline_mode = #tpu.pipeline_mode<synchronous>, transform_indices = @transform_3, window_bounds = array<i64: 128, 32>}, {pipeline_mode = #tpu.pipeline_mode<synchronous>, transform_indices = @transform_4, window_bounds = array<i64: 1, 32>}, {transform_indices = @transform_5, window_bounds = array<i64: 16, 32>}]} {
    %c0 = arith.constant 0 : index
    %c0_0 = arith.constant 0 : index
    %0 = vector.load %arg1[%c0, %c0_0] : memref<16x32xf32, #tpu.memory_space<vmem>>, vector<16x32xf32>
    %1 = arith.truncf %0 : vector<16x32xf32> to vector<16x32xbf16>
    %c0_1 = arith.constant 0 : index
    %c0_2 = arith.constant 0 : index
    %2 = vector.load %arg2[%c0_1, %c0_2] : memref<32x128xbf16, #tpu.memory_space<vmem>>, vector<32x128xbf16>
    %cst = arith.constant dense<0.000000e+00> : vector<16x128xf32>
    %3 = tpu.matmul %1, %2, %cst {dimension_numbers = #tpu.dot_dimension_numbers<[1], [0], [0], [1], [0, 0, 1, 1], [], []>} : vector<16x32xbf16>, vector<32x128xbf16>, vector<16x128xf32> -> vector<16x128xf32>
    %c0_3 = arith.constant 0 : index
    %c0_4 = arith.constant 0 : index
    %4 = vector.load %arg3[%c0_3, %c0_4] : memref<1x128xf32, #tpu.memory_space<vmem>>, vector<1x128xf32>
    %5 = vector.broadcast %4 : vector<1x128xf32> to vector<16x128xf32>
    %6 = arith.addf %3, %5 : vector<16x128xf32>
    %cst_5 = arith.constant 5.000000e-01 : f32
    %7 = vector.broadcast %cst_5 : f32 to vector<16x128xf32>
    %8 = arith.mulf %7, %6 : vector<16x128xf32>
    %cst_6 = arith.constant 4.471500e-02 : f32
    %9 = vector.broadcast %cst_6 : f32 to vector<16x128xf32>
    %10 = arith.mulf %9, %6 : vector<16x128xf32>
    %11 = arith.mulf %10, %6 : vector<16x128xf32>
    %12 = arith.mulf %11, %6 : vector<16x128xf32>
    %13 = arith.addf %6, %12 : vector<16x128xf32>
    %cst_7 = arith.constant 0.797884583 : f32
    %14 = vector.broadcast %cst_7 : f32 to vector<16x128xf32>
    %15 = arith.mulf %14, %13 : vector<16x128xf32>
    %16 = math.tanh %15 : vector<16x128xf32>
    %cst_8 = arith.constant 1.000000e+00 : f32
    %17 = vector.broadcast %cst_8 : f32 to vector<16x128xf32>
    %18 = arith.addf %17, %16 : vector<16x128xf32>
    %19 = arith.mulf %8, %18 : vector<16x128xf32>
    %20 = arith.truncf %19 : vector<16x128xf32> to vector<16x128xbf16>
    %c0_9 = arith.constant 0 : index
    %c0_10 = arith.constant 0 : index
    %21 = vector.load %arg4[%c0_9, %c0_10] : memref<128x32xbf16, #tpu.memory_space<vmem>>, vector<128x32xbf16>
    %cst_11 = arith.constant dense<0.000000e+00> : vector<16x32xf32>
    %22 = tpu.matmul %20, %21, %cst_11 {dimension_numbers = #tpu.dot_dimension_numbers<[1], [0], [0], [1], [0, 0, 1, 1], [], []>} : vector<16x128xbf16>, vector<128x32xbf16>, vector<16x32xf32> -> vector<16x32xf32>
    %c0_12 = arith.constant 0 : index
    %c0_13 = arith.constant 0 : index
    %23 = vector.load %arg5[%c0_12, %c0_13] : memref<1x32xf32, #tpu.memory_space<vmem>>, vector<1x32xf32>
    %24 = vector.broadcast %23 : vector<1x32xf32> to vector<16x32xf32>
    %25 = arith.addf %22, %24 : vector<16x32xf32>
    %c0_14 = arith.constant 0 : index
    %c0_15 = arith.constant 0 : index
    %26 = vector.load %arg6[%c0_14, %c0_15] : memref<16x32xf32, #tpu.memory_space<vmem>>, vector<16x32xf32>
    tpu.vector_store %arg6[%c0_14, %c0_15], %25 {strides = array<i32>} : memref<16x32xf32, #tpu.memory_space<vmem>>, vector<16x32xf32>,
    return
  }
  func.func @transform_0(%arg0: i32) -> (i32, i32) {
    %c0_i32 = arith.constant 0 : i32
    %c0_i32_0 = arith.constant 0 : i32
    return %arg0, %c0_i32 : i32, i32
  }
  func.func @transform_1(%arg0: i32) -> (i32, i32) {
    %c0_i32 = arith.constant 0 : i32
    %c0_i32_0 = arith.constant 0 : i32
    %c0_i32_1 = arith.constant 0 : i32
    return %c0_i32, %c0_i32_0 : i32, i32
  }
  func.func @transform_2(%arg0: i32) -> (i32, i32) {
    %c0_i32 = arith.constant 0 : i32
    %c0_i32_0 = arith.constant 0 : i32
    %c0_i32_1 = arith.constant 0 : i32
    return %c0_i32, %c0_i32_0 : i32, i32
  }
  func.func @transform_3(%arg0: i32) -> (i32, i32) {
    %c0_i32 = arith.constant 0 : i32
    %c0_i32_0 = arith.constant 0 : i32
    %c0_i32_1 = arith.constant 0 : i32
    return %c0_i32, %c0_i32_0 : i32, i32
  }
  func.func @transform_4(%arg0: i32) -> (i32, i32) {
    %c0_i32 = arith.constant 0 : i32
    %c0_i32_0 = arith.constant 0 : i32
    %c0_i32_1 = arith.constant 0 : i32
    return %c0_i32, %c0_i32_0 : i32, i32
  }
  func.func @transform_5(%arg0: i32) -> (i32, i32) {
    %c0_i32 = arith.constant 0 : i32
    %c0_i32_0 = arith.constant 0 : i32
    return %arg0, %c0_i32 : i32, i32
  }
}

</mosaic_0001>

<bundles_post_ra>
// kernel: tpu_custom_call.1
= control target key start
LH: loop header
LB: loop body
LE: loop exit
PB: predicated region body
PF: predicated region fallthrough
CT: control target
= control target key end

     0   :  { %v338_v1 = vmov 0.0   ;;  %vm339_vm0 = vmmov 0   ;;  %vm48_vm1 = vcmask 261120   ;;  %s430_s0 = inlined_call_operand.vmem [shape: f32[16,32], index: 0, kind: input, shape index: {}]   ;;  %s431_s1 = inlined_call_operand.vmem [shape: bf16[32,128], index: 1, kind: input, shape index: {}]   ;;  %s432_s2 = inlined_call_operand.vmem [shape: f32[1,128], index: 2, kind: input, shape index: {}]   ;;  %s433_s3 = inlined_call_operand.vmem [shape: bf16[128,32], index: 3, kind: input, shape index: {}]   ;;  %s434_s4 = inlined_call_operand.vmem [shape: f32[1,32], index: 4, kind: input, shape index: {}]   ;;  %s435_s5 = inlined_call_operand.hbm [shape: f32[16,32], index: 5, kind: output, shape index: {}]  }
   0x1   :  { %v300_v0 = vld [vmem:[%s431_s1] sm:$0xff]   ;;  %267 = vmatprep.subr.bf16.mxu0 %v338_v1  ;;  %275 = vmatprep.subr.bf16.mxu1 %v338_v1  ;;  %v301_v2 = vld [vmem:[%s431_s1 + $0x8] sm:$0xff]  }
   0x2   :  { %268 = vmatpush3.bf16.msra.mxu0 %v300_v0  ;;  %271 = vmatprep.mubr.msk.bf16.mxu0 %vm339_vm0, %v338_v1  ;;  %v22_v3 = vld [vmem:[%s430_s0] sm:$0xff]  ;;  %v23_v4 = vld [vmem:[%s430_s0 + $0x8] sm:$0xff] }
   0x3   :  { %269 = vmatprep.subr.bf16.mxu0 %v338_v1  ;;  %291 = vmatprep.mubr.msk.bf16.mxu1 %vm339_vm0, %v338_v1  ;;  %v24_v5 = vpack.c.bf16 %v23_v4, %v22_v3 }
   0x6   :  { %270 = vmatpush3.bf16.msra.mxu0 %v301_v2 }
   0x7   :  { %10 = vsyncpa [#allocation3], 0  ;;  %v302_v6 = vld [vmem:[%s433_s3] sm:$0xff]   ;;  %v303_v7 = vld [vmem:[%s433_s3 + $0x8] sm:$0xff]   ;;  %s340_s17 = smov [#allocation2]  }
   0x8   :  { %276 = vmatpush3.bf16.msra.mxu1 %v302_v6  ;;  %v304_v8 = vld [vmem:[%s433_s3 + $0x10] sm:$0xff]   ;;  %v305_v9 = vld [vmem:[%s433_s3 + $0x18] sm:$0xff]   ;;  %v306_v10 = vld [vmem:[%s433_s3 + $0x20] sm:$0xff]   ;;  %s231_s18 = sshll.u32 %s340_s17, 4  ;;  %s232_s18 = int_to_ptr.vmem [resolvable:$true] %s231_s18 }
   0x9   :  { %272 = vmatmul.mubr.msk.bf16.vlgmr.msra.gmra.mrb[0].mxu0 %vm48_vm1, %v24_v5  ;;  %277 = vmatprep.subr.bf16.mxu1 %v338_v1  ;;  %v307_v11 = vld [vmem:[%s433_s3 + $0x28] sm:$0xff]   ;;  %v308_v12 = vld [vmem:[%s433_s3 + $0x30] sm:$0xff]   ;;  %v309_v13 = vld [vmem:[%s433_s3 + $0x38] sm:$0xff]   ;;  %s314_s19 = scalar_lea.vmem %s232_s18, 256  ;;  %p319_p1 = scmp.lt.s32.totalorder %s232_s18, %s232_s18 }
   0xa   :  { %v242_v14 = vld [vmem:[%s432_s2] ss:$0 sm:$0xff]  ;;  %p315_p0 = scmp.ne.s32.totalorder %s232_s18, %s314_s19  ;;  %p320_p2 = scmp.lt.s32.totalorder %s314_s19, %s314_s19 }
   0xb   :  { %v246_v40 = vld [vmem:[%s434_s4] ss:$0 sm:$0xff] }
   0xc   :  { %278 = vmatpush3.bf16.msra.mxu1 %v303_v7  ;;  %p321_p3 = por %p320_p2, %p319_p1 }
   0xd   :  { %279 = vmatprep.subr.bf16.mxu1 %v338_v1 }
   0xe   :  { %p322_p4 = pnand %p321_p3, %p315_p0 }
  0x10   :  { %280 = vmatpush3.bf16.msra.mxu1 %v304_v8 }
  0x11   :  { %281 = vmatprep.subr.bf16.mxu1 %v338_v1 }
  0x14   :  { %282 = vmatpush3.bf16.msra.mxu1 %v305_v9 }
  0x15   :  { %283 = vmatprep.subr.bf16.mxu1 %v338_v1 }
  0x18   :  { %284 = vmatpush3.bf16.msra.mxu1 %v306_v10 }
  0x19   :  { %285 = vmatprep.subr.bf16.mxu1 %v338_v1 }
  0x1c   :  { %286 = vmatpush3.bf16.msra.mxu1 %v307_v11 }
  0x1d   :  { %287 = vmatprep.subr.bf16.mxu1 %v338_v1 }
  0x20   :  { %288 = vmatpush3.bf16.msra.mxu1 %v308_v12 }
  0x21   :  { %289 = vmatprep.subr.bf16.mxu1 %v338_v1 }
  0x24   :  { %290 = vmatpush3.bf16.msra.mxu1 %v309_v13 }
  0xdc   :  { %v86_v15 = vpop.f32.mrb[0].mxu0 }
  0xdd   :  { %v87_v16 = vadd.f32 %v242_v14, %v86_v15  ;;  %v273_v17 = vpop.f32.mrb[1].mxu0 }
  0xde   :  { %v89_v18 = vpop.f32.mrb[2].mxu0 }
  0xdf   :  { %v95_v19 = vmul.f32 0.044715, %v87_v16  ;;  %v90_v20 = vadd.f32 %v242_v14, %v89_v18  ;;  %v274_v21 = vpop.f32.mrb[3].mxu0  ;;  %v93_v34 = vmul.f32 0.5, %v87_v16 }
  0xe1   :  { %v97_v22 = vmul.f32 %v95_v19, %v87_v16  ;;  %v96_v23 = vmul.f32 0.044715, %v90_v20  ;;  %v94_v35 = vmul.f32 0.5, %v90_v20 }
  0xe3   :  { %v99_v24 = vmul.f32 %v97_v22, %v87_v16  ;;  %v98_v25 = vmul.f32 %v96_v23, %v90_v20 }
  0xe5   :  { %v100_v26 = vmul.f32 %v98_v25, %v90_v20  ;;  %v101_v27 = vadd.f32 %v99_v24, %v87_v16 }
  0xe7   :  { %v102_v28 = vadd.f32 %v100_v26, %v90_v20  ;;  %v103_v29 = vmul.f32 0.7978846, %v101_v27 }
  0xe9   :  { %v104_v30 = vmul.f32 0.7978846, %v102_v28  ;;  %310 = vtanh.f32 %v103_v29 }
  0xeb   :  { %312 = vtanh.f32 %v104_v30 }
  0xf3   :  { %v311_v31 = vpop.eup %310 }
  0xf4   :  { %v107_v32 = vadd.f32 1.0, %v311_v31 }
  0xf5   :  { %v313_v33 = vpop.eup %312 }
  0xf6   :  { %v108_v36 = vadd.f32 1.0, %v313_v33  ;;  %v109_v37 = vmul.f32 %v107_v32, %v93_v34 }
  0xf8   :  { %v110_v38 = vmul.f32 %v108_v36, %v94_v35 }
  0xfa   :  { %v111_v39 = vpack.c.bf16 %v110_v38, %v109_v37 }
  0xfc   :  { %292 = vmatmul.mubr.bf16.vlgmr.msra.gmra.mrb[0].mxu1 %v111_v39 }
 0x1cf   :  { %v217_v41 = vpop.f32.mrb[0].mxu1 }
 0x1d0   :  { %v218_v42 = vadd.f32 %v246_v40, %v217_v41  ;;  %v293_v43 = vpop.f32.mrb[1].mxu1 }
 0x1d1   :  { %v220_v44 = vpop.f32.mrb[2].mxu1 }
 0x1d2   :  { %224 = vst.msk [vmem:[#allocation2] sm:$0xff] %vm48_vm1, %v218_v42  ;;  %v221_v45 = vadd.f32 %v246_v40, %v220_v44  ;;  %v294_v46 = vpop.f32.mrb[3].mxu1 }
 0x1d4   :  { %225 = vst.msk [vmem:[#allocation2 + $0x8] sm:$0xff] %vm48_vm1, %v221_v45 }
 0x1d5   :  { %325 = shalt.err (!%p322_p4)
}
 0x1d6   :  { %s326_s21 = scalar_lea.hbm %s435_s5, 256 }
 0x1d7   :  { %p327_p5 = scmp.ne.s32.totalorder %s435_s5, %s326_s21  ;;  %p330_p6 = scmp.lt.u32.totalorder %s326_s21, %s435_s5 }
 0x1d9   :  { %p332_p7 = pnand %p330_p6, %p327_p5 }
 0x1db   :  { %335 = shalt.err (!%p332_p7)
}
 0x1dc   :  { %s341_s26 = smov 128   ;;  %s342_s1 = smov 8  }
 0x1dd   :  { %237 = dma.vmem_to_hbm [thread:$0]  %s232_s18, 256, %s435_s5, [#allocation3], %s341_s26, %s341_s26, %s342_s1  }
 0x1de   :  { %336 = dma.done.wait [#allocation3], 256  }
 0x1df   :  { %337 = vsyncadd [#allocation3], 4294967040 }
 0x1e0   :  { %241 = vsyncpa [#allocation3], 1 }

</bundles_post_ra>
